<compile_context>
chip_gen: v6e
topology: v6e:2x2x1
jax: 0.10.0
libtpu: 0.0.40
codegen_flags: <defaults>
</compile_context>

<pallas_src>
import functools

import jax
import jax.numpy as jnp
from jax.experimental import pallas as pl
from jax.experimental.pallas import tpu as pltpu

_LANES = 128


def _swish_kernel(x_ref, o_ref, *, compute_dtype):
    x = x_ref[...].astype(compute_dtype)
    # sigmoid(x) == 0.5 * tanh(0.5 * x) + 0.5 : one EUP transcendental per
    # element, no exact divide (which lowers to a multi-step VALU chain).
    half = jnp.asarray(0.5, compute_dtype)
    y = x * (jnp.tanh(x * half) * half + half)
    o_ref[...] = y.astype(o_ref.dtype)


def _round_up(a: int, m: int) -> int:
    return -(-a // m) * m


def _pack_rows(dtype) -> int:
    # Sublane packing: f32 -> 8 rows/vreg, bf16/f16 -> 16, int8/fp8 -> 32.
    return {4: 8, 2: 16, 1: 32}.get(jnp.dtype(dtype).itemsize, 8)


@functools.lru_cache(maxsize=None)
def _chip_config():
    """Returns (block_bytes, vmem_limit_bytes|None, split_two_cores, bf16_ok)."""
    gen = None
    try:
        kind = jax.devices()[0].device_kind.lower()
        for g in (7, 6, 5, 4, 3, 2):
            if f"v{g}" in kind or f"tpu{g}" in kind or (g == 7 and "7x" in kind):
                gen = g
                break
    except Exception:  # pragma: no cover - defensive
        gen = None

    if gen is not None and gen >= 7:
        # v7x: 64 MiB physical / 32 MiB default scoped VMEM, 2 TCs, 3.2 TB/s.
        # 8 MiB block -> 2 bufs x (in+out) = 32 MiB, cap well under 48 MiB.
        return (8 << 20, 48 << 20, True, True)
    if gen == 6:
        # v6e: 128 MiB physical / 32 MiB default scoped VMEM, 1 TC.
        return (8 << 20, 64 << 20, False, True)
    if gen == 5:
        # v5e: 128 MiB physical / 16 MiB default scoped VMEM, no bf16 VPU/EUP.
        return (4 << 20, 32 << 20, False, False)
    # Unknown / older chip: stay within default scoped VMEM limits.
    return (2 << 20, None, False, False)


def _swish_2d(x2d, *, compute_dtype, block_bytes, vmem_limit, split_two_cores,
              donate):
    """Run the swish kernel over a lane-dense (rows, 128) slab."""
    rows, lanes = x2d.shape
    dtype = x2d.dtype
    itemsize = jnp.dtype(dtype).itemsize
    pack = _pack_rows(dtype)

    # Largest tile (rows) that keeps one block under block_bytes, rounded to
    # the packed sublane tile.
    max_tr = max(pack, (block_bytes // (lanes * itemsize)) // pack * pack)

    if rows > max_tr:
        tr = max_tr
    elif split_two_cores and rows >= 2 * pack:
        # >= 2 grid steps so both v7x TensorCores stream half of the slab.
        tr = _round_up(-(-rows // 2), pack)
    else:
        # Single-TC chips (v5e/v6e): one full-size block, one grid step.
        tr = rows

    grid = (pl.cdiv(rows, tr),)
    n = rows * lanes
    kernel = functools.partial(_swish_kernel, compute_dtype=compute_dtype)

    return pl.pallas_call(
        kernel,
        out_shape=jax.ShapeDtypeStruct((rows, lanes), dtype),
        grid_spec=pltpu.PrefetchScalarGridSpec(
            num_scalar_prefetch=0,
            grid=grid,
            in_specs=[pl.BlockSpec((tr, lanes), lambda i: (i, 0))],
            out_specs=pl.BlockSpec((tr, lanes), lambda i: (i, 0)),
        ),
        compiler_params=pltpu.CompilerParams(
            dimension_semantics=("parallel",),
            vmem_limit_bytes=vmem_limit,
        ),
        cost_estimate=pl.CostEstimate(
            flops=4 * n, transcendentals=n, bytes_accessed=2 * n * itemsize),
        input_output_aliases=({0: 0} if donate else {}),
    )(x2d)


def swish(x: jax.Array, *, block_bytes: int | None = None,
          donate_input: bool = False) -> jax.Array:
    """Elementwise x * sigmoid(x) via a Pallas TPU kernel. Any shape/dtype.

    donate_input=True aliases the kernel input to its output (only safe if the
    caller no longer needs x); default off to avoid a defensive XLA copy.
    """
    orig_shape = x.shape
    dtype = x.dtype
    n = x.size
    if n == 0:
        return x

    cfg_block, vmem_limit, split_two, bf16_ok = _chip_config()
    if block_bytes is None:
        block_bytes = cfg_block

    if bf16_ok and dtype in (jnp.dtype(jnp.bfloat16), jnp.dtype(jnp.float16)):
        compute_dtype = dtype          # v6e/v7x: native bf16 VPU/EUP
    else:
        compute_dtype = jnp.float32    # v5e or f32/int inputs

    x_flat = x.reshape(-1)
    n_main = (n // _LANES) * _LANES

    parts = []
    if n_main:
        rows = n_main // _LANES
        x2d = (x_flat if n_main == n else x_flat[:n_main]).reshape(rows, _LANES)
        y2d = _swish_2d(
            x2d,
            compute_dtype=compute_dtype,
            block_bytes=block_bytes,
            vmem_limit=vmem_limit,
            split_two_cores=split_two,
            donate=donate_input and n_main == n,
        )
        if n_main == n:
            # Fast path (all conv activations): zero-copy reshape, no tail.
            return y2d.reshape(orig_shape)
        parts.append(y2d.reshape(-1))

    # Ragged tail (< 128 elements): plain jnp instead of padding the whole
    # array (old path = jnp.pad + output slice = two extra full HBM passes).
    tail = x_flat[n_main:].astype(compute_dtype)
    half = jnp.asarray(0.5, compute_dtype)
    tail_y = (tail * (jnp.tanh(tail * half) * half + half)).astype(dtype)
    parts.append(tail_y)

    y_flat = jnp.concatenate(parts) if len(parts) > 1 else parts[0]
    return y_flat.reshape(orig_shape)


class Nonlinearity:
    """JAX/Pallas equivalent of the PyTorch `nonlinearity` module (Swish)."""

    def __init__(self):
        pass  # no parameters

    def __call__(self, x):
        return swish(x)


def _ref_swish(x):
    xf = x.astype(jnp.float32)
    return (xf * jax.nn.sigmoid(xf)).astype(x.dtype)


if __name__ == "__main__":
    key = jax.random.PRNGKey(0)
    mod = Nonlinearity()

    # NCHW input, same convention as the PyTorch module sees from a conv.
    x = jax.random.normal(key, (2, 4, 16, 16), dtype=jnp.float32)
    y = jax.block_until_ready(mod(x))
    assert y.shape == x.shape and y.dtype == x.dtype
    assert float(jnp.max(jnp.abs(y - _ref_swish(x)))) < 1e-5

    # Ragged numel < 128: pure-jnp tail path.
    x2 = jax.random.normal(jax.random.PRNGKey(1), (3, 5, 7), dtype=jnp.float32)
    y2 = jax.block_until_ready(mod(x2))
    assert y2.shape == x2.shape and y2.dtype == x2.dtype
    assert float(jnp.max(jnp.abs(y2 - _ref_swish(x2)))) < 1e-5

    # Ragged numel > 128: kernel on the aligned prefix + jnp tail (no pad).
    x3 = jax.random.normal(jax.random.PRNGKey(3), (3, 7, 19), dtype=jnp.float32)
    y3 = jax.block_until_ready(mod(x3))
    assert y3.shape == x3.shape and y3.dtype == x3.dtype
    assert float(jnp.max(jnp.abs(y3 - _ref_swish(x3)))) < 1e-5

    # bf16 path (native bf16 compute on v6e/v7x, f32 on v5e).
    xb = jax.random.normal(jax.random.PRNGKey(2), (2, 4, 16, 16),
                           dtype=jnp.bfloat16)
    yb = jax.block_until_ready(mod(xb))
    assert yb.shape == xb.shape and yb.dtype == xb.dtype
    assert float(jnp.max(jnp.abs(
        yb.astype(jnp.float32) - _ref_swish(xb).astype(jnp.float32)))) < 2e-2

    # bf16 with an under-packed partial trailing block (rows=40, forced tr=16,
    # last block 8 rows) — exercises Mosaic's masking of a sub-(16,128) tile.
    xp = jax.random.normal(jax.random.PRNGKey(4), (40, 128), dtype=jnp.bfloat16)
    yp = jax.block_until_ready(swish(xp, block_bytes=16 * 128 * 2))
    assert yp.shape == xp.shape and yp.dtype == xp.dtype
    assert float(jnp.max(jnp.abs(
        yp.astype(jnp.float32) - _ref_swish(xp).astype(jnp.float32)))) < 2e-2

    print("KERNEL_OK")
</pallas_src>

<mosaic_0001>
module attributes {stable_mosaic.version = 11 : i64} {
  func.func @_swish_kernel(%arg0: i32, %arg1: memref<16x128xf32, #tpu.memory_space<vmem>>, %arg2: memref<16x128xf32, #tpu.memory_space<vmem>>) attributes {dimension_semantics = [#tpu.dimension_semantics<parallel>], iteration_bounds = array<i64: 1>, scalar_prefetch = 0 : i64, scratch_operands = 0 : i64, tpu.core_type = #tpu.core_type<tc>, window_params = [{transform_indices = @transform_0, window_bounds = array<i64: 16, 128>}, {transform_indices = @transform_1, window_bounds = array<i64: 16, 128>}]} {
    %c0 = arith.constant 0 : index
    %c0_0 = arith.constant 0 : index
    %0 = vector.load %arg1[%c0, %c0_0] : memref<16x128xf32, #tpu.memory_space<vmem>>, vector<16x128xf32>
    %cst = arith.constant 5.000000e-01 : f32
    %1 = vector.broadcast %cst : f32 to vector<16x128xf32>
    %2 = arith.mulf %0, %1 : vector<16x128xf32>
    %3 = math.tanh %2 : vector<16x128xf32>
    %cst_1 = arith.constant 5.000000e-01 : f32
    %4 = vector.broadcast %cst_1 : f32 to vector<16x128xf32>
    %5 = arith.mulf %3, %4 : vector<16x128xf32>
    %cst_2 = arith.constant 5.000000e-01 : f32
    %6 = vector.broadcast %cst_2 : f32 to vector<16x128xf32>
    %7 = arith.addf %5, %6 : vector<16x128xf32>
    %8 = arith.mulf %0, %7 : vector<16x128xf32>
    %c0_3 = arith.constant 0 : index
    %c0_4 = arith.constant 0 : index
    %9 = vector.load %arg2[%c0_3, %c0_4] : memref<16x128xf32, #tpu.memory_space<vmem>>, vector<16x128xf32>
    tpu.vector_store %arg2[%c0_3, %c0_4], %8 {strides = array<i32>} : memref<16x128xf32, #tpu.memory_space<vmem>>, vector<16x128xf32>,
    return
  }
  func.func @transform_0(%arg0: i32) -> (i32, i32) {
    %c0_i32 = arith.constant 0 : i32
    %c0_i32_0 = arith.constant 0 : i32
    return %arg0, %c0_i32 : i32, i32
  }
  func.func @transform_1(%arg0: i32) -> (i32, i32) {
    %c0_i32 = arith.constant 0 : i32
    %c0_i32_0 = arith.constant 0 : i32
    return %arg0, %c0_i32 : i32, i32
  }
}

</mosaic_0001>

<bundles_post_ra>
// kernel: tpu_custom_call.1
= control target key start
LH: loop header
LB: loop body
LE: loop exit
PB: predicated region body
PF: predicated region fallthrough
CT: control target
= control target key end

     0   :  { %6 = vsyncpa [#allocation3], 0  ;;  %s132_s0 = inlined_call_operand.hbm [shape: f32[16,128], index: 0, kind: input, shape index: {}]   ;;  %s133_s1 = inlined_call_operand.hbm [shape: f32[16,128], index: 1, kind: output, shape index: {}]  }
   0x1   :  { %7 = vsyncpa [#allocation4], 0  ;;  %s106_s6 = smov [#allocation2]  }
   0x2   :  { %s13_s7 = sshll.u32 %s106_s6, 4  ;;  %s14_s7 = int_to_ptr.vmem [resolvable:$true] %s13_s7 }
   0x3   :  { %s70_s8 = scalar_lea.vmem %s14_s7, 256  ;;  %p75_p1 = scmp.lt.s32.totalorder %s14_s7, %s14_s7 }
   0x4   :  { %p71_p0 = scmp.ne.s32.totalorder %s14_s7, %s70_s8  ;;  %p76_p2 = scmp.lt.s32.totalorder %s70_s8, %s70_s8 }
   0x6   :  { %p77_p3 = por %p76_p2, %p75_p1 }
   0x8   :  { %p78_p4 = pnand %p77_p3, %p71_p0 }
   0xa   :  { %81 = shalt.err (!%p78_p4)
}
   0xb   :  { %s107_s9 = smov 128   ;;  %s108_s10 = smov 8  }
   0xc   :  { %19 = dma.hbm_to_vmem [thread:$0]  %s132_s0, 256, %s14_s7, [#allocation3], %s107_s9, %s107_s9, %s108_s10  }
   0xd   :  { %102 = dma.done.wait [#allocation3], 256  }
   0xe   :  { %103 = vsyncadd [#allocation3], 4294967040  ;;  %v23_v0 = vld [vmem:[#allocation2] sm:$0xff]  ;;  %v24_v1 = vld [vmem:[#allocation2 + $0x8] sm:$0xff]  ;;  %s109_s13 = smov [#allocation5]  }
   0xf   :  { %v25_v2 = vmul.f32 0.5, %v23_v0  ;;  %v26_v3 = vmul.f32 0.5, %v24_v1  ;;  %s42_s14 = sshll.u32 %s109_s13, 4  ;;  %s43_s14 = int_to_ptr.vmem [resolvable:$true] %s42_s14 }
  0x10   :  { %s82_s0 = scalar_lea.vmem %s43_s14, 256  ;;  %p87_p6 = scmp.lt.s32.totalorder %s43_s14, %s43_s14 }
  0x11   :  { %58 = vtanh.f32 %v25_v2  ;;  %p83_p5 = scmp.ne.s32.totalorder %s43_s14, %s82_s0  ;;  %p88_p7 = scmp.lt.s32.totalorder %s82_s0, %s82_s0 }
  0x12   :  { %60 = vtanh.f32 %v26_v3 }
  0x13   :  { %p89_p8 = por %p88_p7, %p87_p6 }
  0x15   :  { %p90_p9 = pnand %p89_p8, %p83_p5 }
  0x1e   :  { %v59_v4 = vpop.eup %58 }
  0x1f   :  { %v61_v5 = vpop.eup %60  ;;  %v29_v6 = vmul.f32 0.5, %v59_v4 }
  0x20   :  { %v30_v7 = vmul.f32 0.5, %v61_v5 }
  0x21   :  { %v31_v8 = vadd.f32 0.5, %v29_v6 }
  0x22   :  { %v32_v9 = vadd.f32 0.5, %v30_v7 }
  0x23   :  { %v33_v10 = vmul.f32 %v31_v8, %v23_v0 }
  0x24   :  { %v34_v11 = vmul.f32 %v32_v9, %v24_v1 }
  0x25   :  { %35 = vst [vmem:[#allocation5] sm:$0xff] %v33_v10 }
  0x26   :  { %36 = vst [vmem:[#allocation5 + $0x8] sm:$0xff] %v34_v11 }
  0x27   :  { %93 = shalt.err (!%p90_p9)
}
  0x28   :  { %48 = dma.vmem_to_hbm [thread:$0]  %s43_s14, 256, %s133_s1, [#allocation4], %s107_s9, %s107_s9, %s108_s10  }
  0x29   :  { %104 = dma.done.wait [#allocation4], 256  }
  0x2a   :  { %105 = vsyncadd [#allocation4], 4294967040 }
  0x2b   :  { %52 = vsyncpa [#allocation3], 1 }
  0x2c   :  { %53 = vsyncpa [#allocation4], 1 }

</bundles_post_ra>
